<compile_context>
chip_gen: v5e
topology: v5e:2x2
jax: 0.10.0
libtpu: 0.0.40
codegen_flags: <defaults>
</compile_context>

<pallas_src>
import jax
import jax.numpy as jnp
import numpy as np
from jax.experimental import pallas as pl
from jax.experimental.pallas import tpu as pltpu

# Small, deterministic model configuration.
OUTPUT_DIM = 64   # vocab size (V)
EMB_DIM    = 16
HIDDEN_DIM = 32   # H
NUM_LAYERS = 2
BATCH      = 8
SEQ_LEN    = 8    # decode steps run inside one kernel call

N_LANES = 128

# Packed-weight slab layout: [K_PAD, 128] f32; every block starts at lane 0.
#   rows   0:128 lanes 0:64 : fused matmul-1 RHS
#            rows   0:64  cols 0:32 = emb @ W_ih0 + b0   (bias folded via one-hot)
#            rows   0:64  cols 32:64 = b1                (bias folded via one-hot)
#            rows  64:96  cols 0:32 = W_hh0
#            rows  96:128 cols 32:64 = W_hh1
#   rows 128:160 lanes 0:32 : W_ih1
#   rows 160:192 lanes 0:64 : W_out
#   row  192     lanes 0:64 : b_out
R_IH1  = OUTPUT_DIM + 2 * HIDDEN_DIM      # 128
R_OUT  = R_IH1 + HIDDEN_DIM               # 160
R_BIAS = R_OUT + HIDDEN_DIM                # 192
K_PAD  = 200                               # rows used: 193, rounded up to x8


def decoder_rnn_kernel(ids_ref, h_init_ref, w_ref, out_ref, h_scr):
    f32 = jnp.float32
    V, H, B = OUTPUT_DIM, HIDDEN_DIM, BATCH
    t = pl.program_id(0)

    # Hidden state lives in a [B, 128] VMEM scratch across steps
    # (lanes 0:64 unused/garbage, lanes 64:96 = h0, lanes 96:128 = h1).
    @pl.when(t == 0)
    def _():
        h_scr[...] = h_init_ref[...]

    # --- vectorized one-hot + fused LHS build (one compare + one select) ---
    lane = jax.lax.broadcasted_iota(jnp.int32, (B, N_LANES), 1)
    ids_col = ids_ref[0]                                   # [B, 1] int32
    one_hot = (lane == ids_col).astype(f32)                # [B, 128]
    # dropout(embedded): identity in inference mode.
    # x = [one_hot(64) | h0(32) | h1(32)]  -> exactly one full-lane vreg.
    x = jnp.where(lane < V, one_hot, h_scr[...])           # [B, 128]

    # --- MXU pass 1 (K=128): layer-0 ih+hh (+biases) and layer-1 hh, fused ---
    r1 = jnp.dot(x, w_ref[0:V + 2 * H, 0:2 * H],
                 preferred_element_type=f32)               # [B, 64]
    h0n = jnp.tanh(r1[:, 0:H])                             # layer-0 new hidden

    # --- MXU pass 2 (K=32): layer-1 input projection; hh-part + b1 already in r1 ---
    h1n = jnp.tanh(
        jnp.dot(h0n, w_ref[R_IH1:R_IH1 + H, 0:H], preferred_element_type=f32)
        + r1[:, H:2 * H])

    # --- MXU pass 3: fc_out on output.squeeze(0); seq_len==1 per step so output==h1n ---
    pred = (jnp.dot(h1n, w_ref[R_OUT:R_OUT + H, 0:V], preferred_element_type=f32)
            + w_ref[R_BIAS:R_BIAS + 1, 0:V])

    # --- single lane-dense [B, 128] store per step: [pred(64) | h0n(32) | h1n(32)] ---
    step_out = jnp.concatenate([pred, h0n, h1n], axis=1)
    out_ref[0] = step_out
    h_scr[...] = step_out     # lanes 64:128 carry the new hidden to the next step


@jax.jit
def decoder_rnn_decode(token_ids, hidden, cell, w_slab):
    """Run T teacher-forced Decoder_RNN steps inside ONE fused kernel.

    token_ids: [T, B] int32; hidden/cell: [L, B, H].
    Returns (predictions [T, B, V], new hidden [L, B, H]).
    Step t is exactly Decoder_RNN.forward(token_ids[t], hidden_t, cell).
    TODO(synk): greedy (argmax-feedback) decoding not implemented; tokens are provided.
    """
    del cell  # nn.RNN uses only the hidden state
    T = token_ids.shape[0]
    ids = token_ids.astype(jnp.int32).reshape(T, BATCH, 1)

    # hidden [L, B, H] -> lane-dense [B, 128] slab (once per decode, not per step).
    h_cat = jnp.transpose(hidden, (1, 0, 2)).reshape(BATCH, NUM_LAYERS * HIDDEN_DIM)
    h_slab = jnp.zeros((BATCH, N_LANES), jnp.float32).at[:, OUTPUT_DIM:].set(h_cat)

    out = pl.pallas_call(
        decoder_rnn_kernel,
        out_shape=jax.ShapeDtypeStruct((T, BATCH, N_LANES), jnp.float32),
        grid=(T,),
        in_specs=[
            # per-step token-id column
            pl.BlockSpec((1, BATCH, 1), lambda t: (t, 0, 0)),
            # initial hidden slab: constant block -> resident in VMEM
            pl.BlockSpec((BATCH, N_LANES), lambda t: (0, 0)),
            # packed weight slab: constant block -> DMA'd once, resident in VMEM
            pl.BlockSpec((K_PAD, N_LANES), lambda t: (0, 0)),
        ],
        out_specs=pl.BlockSpec((1, BATCH, N_LANES), lambda t: (t, 0, 0)),
        scratch_shapes=[pltpu.VMEM((BATCH, N_LANES), jnp.float32)],
        compiler_params=pltpu.CompilerParams(
            dimension_semantics=("arbitrary",)),   # time steps are sequential
    )(ids, h_slab, w_slab)

    preds = out[:, :, :OUTPUT_DIM]                       # [T, B, V]
    h_last = out[-1, :, OUTPUT_DIM:]                     # [B, 2H]
    hidden_new = jnp.stack(
        [h_last[:, :HIDDEN_DIM], h_last[:, HIDDEN_DIM:]], axis=0)
    return preds, hidden_new


def decoder_rnn_forward(token_ids, hidden, cell, w_slab):
    """Exact Decoder_RNN.forward(input, hidden, cell): a single decode step."""
    preds, hidden_new = decoder_rnn_decode(token_ids[None, :], hidden, cell, w_slab)
    return preds[0], hidden_new


def init_params(key):
    ks = jax.random.split(key, 11)
    sh = 1.0 / np.sqrt(HIDDEN_DIM)

    def u(k, shape, scale):
        return jax.random.uniform(k, shape, jnp.float32, -scale, scale)

    return dict(
        emb=jax.random.normal(ks[0], (OUTPUT_DIM, EMB_DIM), jnp.float32),
        wih0=u(ks[1], (EMB_DIM, HIDDEN_DIM), sh),
        whh0=u(ks[2], (HIDDEN_DIM, HIDDEN_DIM), sh),
        b0=u(ks[3], (1, HIDDEN_DIM), sh) + u(ks[4], (1, HIDDEN_DIM), sh),  # b_ih + b_hh
        wih1=u(ks[5], (HIDDEN_DIM, HIDDEN_DIM), sh),
        whh1=u(ks[6], (HIDDEN_DIM, HIDDEN_DIM), sh),
        b1=u(ks[7], (1, HIDDEN_DIM), sh) + u(ks[8], (1, HIDDEN_DIM), sh),
        wout=u(ks[9], (HIDDEN_DIM, OUTPUT_DIM), sh),
        bout=u(ks[10], (1, OUTPUT_DIM), sh),
    )


def pack_weights(params):
    """Host-side one-time packing of all weights/biases into one [K_PAD, 128] slab."""
    hi = jax.lax.Precision.HIGHEST
    V, H = OUTPUT_DIM, HIDDEN_DIM
    slab = jnp.zeros((K_PAD, N_LANES), jnp.float32)
    # Fused matmul-1 RHS. Biases b0/b1 are folded into the one-hot rows:
    # exactly one one-hot lane is 1, so the matmul picks each bias up once.
    slab = slab.at[0:V, 0:H].set(
        jnp.dot(params["emb"], params["wih0"], precision=hi) + params["b0"])
    slab = slab.at[0:V, H:2 * H].set(jnp.broadcast_to(params["b1"], (V, H)))
    slab = slab.at[V:V + H, 0:H].set(params["whh0"])
    slab = slab.at[V + H:V + 2 * H, H:2 * H].set(params["whh1"])
    # Layer-1 input projection.
    slab = slab.at[R_IH1:R_IH1 + H, 0:H].set(params["wih1"])
    # fc_out weight and bias.
    slab = slab.at[R_OUT:R_OUT + H, 0:V].set(params["wout"])
    slab = slab.at[R_BIAS:R_BIAS + 1, 0:V].set(params["bout"])
    return slab


def reference_step(token_ids, hidden, params):
    hi = jax.lax.Precision.HIGHEST
    x = params["emb"][token_ids]                                               # [B, E]
    h0n = jnp.tanh(jnp.dot(x, params["wih0"], precision=hi)
                   + jnp.dot(hidden[0], params["whh0"], precision=hi) + params["b0"])
    h1n = jnp.tanh(jnp.dot(h0n, params["wih1"], precision=hi)
                   + jnp.dot(hidden[1], params["whh1"], precision=hi) + params["b1"])
    pred = jnp.dot(h1n, params["wout"], precision=hi) + params["bout"]
    return pred, jnp.stack([h0n, h1n], axis=0)


def reference_decode(token_ids, hidden, params):
    preds, h = [], hidden
    for t in range(token_ids.shape[0]):
        p, h = reference_step(token_ids[t], h, params)
        preds.append(p)
    return jnp.stack(preds, axis=0), h


if __name__ == "__main__":
    key = jax.random.PRNGKey(0)
    k_ids, k_h, k_c, k_p = jax.random.split(key, 4)

    token_ids = jax.random.randint(k_ids, (SEQ_LEN, BATCH), 0, OUTPUT_DIM, dtype=jnp.int32)
    hidden = jax.random.normal(k_h, (NUM_LAYERS, BATCH, HIDDEN_DIM), jnp.float32)
    cell   = jax.random.normal(k_c, (NUM_LAYERS, BATCH, HIDDEN_DIM), jnp.float32)
    params = init_params(k_p)
    w_slab = pack_weights(params)

    # Multi-step fused decode (the whole time loop inside one pallas_call).
    preds, hnew = decoder_rnn_decode(token_ids, hidden, cell, w_slab)
    preds = jax.block_until_ready(preds)
    hnew = jax.block_until_ready(hnew)

    preds_ref, hnew_ref = reference_decode(token_ids, hidden, params)
    np.testing.assert_allclose(np.asarray(preds), np.asarray(preds_ref), rtol=5e-4, atol=5e-5)
    np.testing.assert_allclose(np.asarray(hnew), np.asarray(hnew_ref), rtol=5e-4, atol=5e-5)

    # Single-step call: exact module-forward parity (prediction, hidden).
    pred1, h1 = decoder_rnn_forward(token_ids[0], hidden, cell, w_slab)
    pred1 = jax.block_until_ready(pred1)
    h1 = jax.block_until_ready(h1)
    pred1_ref, h1_ref = reference_step(token_ids[0], hidden, params)
    np.testing.assert_allclose(np.asarray(pred1), np.asarray(pred1_ref), rtol=5e-4, atol=5e-5)
    np.testing.assert_allclose(np.asarray(h1), np.asarray(h1_ref), rtol=5e-4, atol=5e-5)

    print("KERNEL_OK")
</pallas_src>

<mosaic_0001>
module attributes {stable_mosaic.version = 11 : i64} {
  func.func @decoder_rnn_kernel(%arg0: i32, %arg1: memref<1x8x1xi32, #tpu.memory_space<vmem>>, %arg2: memref<8x128xf32, #tpu.memory_space<vmem>>, %arg3: memref<200x128xf32, #tpu.memory_space<vmem>>, %arg4: memref<1x8x128xf32, #tpu.memory_space<vmem>>, %arg5: memref<8x128xf32, #tpu.memory_space<vmem>>) attributes {dimension_semantics = [#tpu.dimension_semantics<arbitrary>], iteration_bounds = array<i64: 8>, scalar_prefetch = 0 : i64, scratch_operands = 1 : i64, tpu.core_type = #tpu.core_type<tc>, window_params = [{transform_indices = @transform_0, window_bounds = array<i64: 1, 8, 1>}, {pipeline_mode = #tpu.pipeline_mode<synchronous>, transform_indices = @transform_1, window_bounds = array<i64: 8, 128>}, {pipeline_mode = #tpu.pipeline_mode<synchronous>, transform_indices = @transform_2, window_bounds = array<i64: 200, 128>}, {transform_indices = @transform_3, window_bounds = array<i64: 1, 8, 128>}]} {
    %c0_i32 = arith.constant 0 : i32
    %0 = arith.cmpi eq, %arg0, %c0_i32 : i32
    %1 = arith.extui %0 : i1 to i32
    %c0_i32_0 = arith.constant 0 : i32
    %2 = arith.cmpi ne, %1, %c0_i32_0 : i32
    scf.if %2 {
      %c0_17 = arith.constant 0 : index
      %c0_18 = arith.constant 0 : index
      %33 = vector.load %arg2[%c0_17, %c0_18] : memref<8x128xf32, #tpu.memory_space<vmem>>, vector<8x128xf32>
      %c0_19 = arith.constant 0 : index
      %c0_20 = arith.constant 0 : index
      %34 = vector.load %arg5[%c0_19, %c0_20] : memref<8x128xf32, #tpu.memory_space<vmem>>, vector<8x128xf32>
      tpu.vector_store %arg5[%c0_19, %c0_20], %33 {strides = array<i32>} : memref<8x128xf32, #tpu.memory_space<vmem>>, vector<8x128xf32>,
    } else {
    }
    %3 = tpu.iota {dimensions = array<i32: 1>} : vector<8x128xi32>
    %c0 = arith.constant 0 : index
    %c0_1 = arith.constant 0 : index
    %c0_2 = arith.constant 0 : index
    %4 = vector.load %arg1[%c0, %c0_1, %c0_2] : memref<1x8x1xi32, #tpu.memory_space<vmem>>, vector<1x8x1xi32>
    %5 = vector.shape_cast %4 : vector<1x8x1xi32> to vector<8x1xi32>
    %6 = vector.broadcast %5 : vector<8x1xi32> to vector<8x128xi32>
    %7 = arith.cmpi eq, %3, %6 : vector<8x128xi32>
    %8 = arith.extui %7 : vector<8x128xi1> to vector<8x128xi32>
    %9 = arith.sitofp %8 : vector<8x128xi32> to vector<8x128xf32>
    %c64_i32 = arith.constant 64 : i32
    %10 = vector.broadcast %c64_i32 : i32 to vector<8x128xi32>
    %11 = arith.cmpi slt, %3, %10 : vector<8x128xi32>
    %c0_3 = arith.constant 0 : index
    %c0_4 = arith.constant 0 : index
    %12 = vector.load %arg5[%c0_3, %c0_4] : memref<8x128xf32, #tpu.memory_space<vmem>>, vector<8x128xf32>
    %13 = arith.select %11, %9, %12 : vector<8x128xi1>, vector<8x128xf32>
    %c0_5 = arith.constant 0 : index
    %c0_6 = arith.constant 0 : index
    %14 = vector.load %arg3[%c0_5, %c0_6] : memref<200x128xf32, #tpu.memory_space<vmem>>, vector<128x64xf32>
    %cst = arith.constant dense<0.000000e+00> : vector<8x64xf32>
    %15 = tpu.matmul %13, %14, %cst {dimension_numbers = #tpu.dot_dimension_numbers<[1], [0], [0], [1], [0, 0, 1, 1], [], []>} : vector<8x128xf32>, vector<128x64xf32>, vector<8x64xf32> -> vector<8x64xf32>
    %16 = vector.extract_strided_slice %15 {offsets = [0, 0], sizes = [8, 32], strides = [1, 1]} : vector<8x64xf32> to vector<8x32xf32>
    %17 = math.tanh %16 : vector<8x32xf32>
    %c128 = arith.constant 128 : index
    %c0_7 = arith.constant 0 : index
    %18 = vector.load %arg3[%c128, %c0_7] : memref<200x128xf32, #tpu.memory_space<vmem>>, vector<32x32xf32>
    %cst_8 = arith.constant dense<0.000000e+00> : vector<8x32xf32>
    %19 = tpu.matmul %17, %18, %cst_8 {dimension_numbers = #tpu.dot_dimension_numbers<[1], [0], [0], [1], [0, 0, 1, 1], [], []>} : vector<8x32xf32>, vector<32x32xf32>, vector<8x32xf32> -> vector<8x32xf32>
    %20 = vector.extract_strided_slice %15 {offsets = [0, 32], sizes = [8, 32], strides = [1, 1]} : vector<8x64xf32> to vector<8x32xf32>
    %21 = arith.addf %19, %20 : vector<8x32xf32>
    %22 = math.tanh %21 : vector<8x32xf32>
    %c160 = arith.constant 160 : index
    %c0_9 = arith.constant 0 : index
    %23 = vector.load %arg3[%c160, %c0_9] : memref<200x128xf32, #tpu.memory_space<vmem>>, vector<32x64xf32>
    %cst_10 = arith.constant dense<0.000000e+00> : vector<8x64xf32>
    %24 = tpu.matmul %22, %23, %cst_10 {dimension_numbers = #tpu.dot_dimension_numbers<[1], [0], [0], [1], [0, 0, 1, 1], [], []>} : vector<8x32xf32>, vector<32x64xf32>, vector<8x64xf32> -> vector<8x64xf32>
    %c192 = arith.constant 192 : index
    %c0_11 = arith.constant 0 : index
    %25 = vector.load %arg3[%c192, %c0_11] : memref<200x128xf32, #tpu.memory_space<vmem>>, vector<1x64xf32>
    %26 = vector.broadcast %25 : vector<1x64xf32> to vector<8x64xf32>
    %27 = arith.addf %24, %26 : vector<8x64xf32>
    %28 = tpu.concatenate %27, %17, %22 in 1 : vector<8x64xf32>, vector<8x32xf32>, vector<8x32xf32> -> vector<8x128xf32>
    %c0_12 = arith.constant 0 : index
    %c0_13 = arith.constant 0 : index
    %c0_14 = arith.constant 0 : index
    %29 = vector.load %arg4[%c0_12, %c0_13, %c0_14] : memref<1x8x128xf32, #tpu.memory_space<vmem>>, vector<1x8x128xf32>
    %30 = vector.shape_cast %29 : vector<1x8x128xf32> to vector<8x128xf32>
    %31 = vector.shape_cast %28 : vector<8x128xf32> to vector<1x8x128xf32>
    tpu.vector_store %arg4[%c0_12, %c0_13, %c0_14], %31 {strides = array<i32>} : memref<1x8x128xf32, #tpu.memory_space<vmem>>, vector<1x8x128xf32>,
    %c0_15 = arith.constant 0 : index
    %c0_16 = arith.constant 0 : index
    %32 = vector.load %arg5[%c0_15, %c0_16] : memref<8x128xf32, #tpu.memory_space<vmem>>, vector<8x128xf32>
    tpu.vector_store %arg5[%c0_15, %c0_16], %28 {strides = array<i32>} : memref<8x128xf32, #tpu.memory_space<vmem>>, vector<8x128xf32>,
    return
  }
  func.func @transform_0(%arg0: i32) -> (i32, i32, i32) {
    %c0_i32 = arith.constant 0 : i32
    %c0_i32_0 = arith.constant 0 : i32
    %c0_i32_1 = arith.constant 0 : i32
    return %arg0, %c0_i32, %c0_i32_0 : i32, i32, i32
  }
  func.func @transform_1(%arg0: i32) -> (i32, i32) {
    %c0_i32 = arith.constant 0 : i32
    %c0_i32_0 = arith.constant 0 : i32
    %c0_i32_1 = arith.constant 0 : i32
    return %c0_i32, %c0_i32_0 : i32, i32
  }
  func.func @transform_2(%arg0: i32) -> (i32, i32) {
    %c0_i32 = arith.constant 0 : i32
    %c0_i32_0 = arith.constant 0 : i32
    %c0_i32_1 = arith.constant 0 : i32
    return %c0_i32, %c0_i32_0 : i32, i32
  }
  func.func @transform_3(%arg0: i32) -> (i32, i32, i32) {
    %c0_i32 = arith.constant 0 : i32
    %c0_i32_0 = arith.constant 0 : i32
    %c0_i32_1 = arith.constant 0 : i32
    return %arg0, %c0_i32, %c0_i32_0 : i32, i32, i32
  }
}

</mosaic_0001>

<bundles_post_ra>
// kernel: decoder_rnn_decode.1
= control target key start
LH: loop header
LB: loop body
LE: loop exit
PB: predicated region body
PF: predicated region fallthrough
CT: control target
= control target key end

     0   :  { %8 = vsyncpa [#allocation4], 0  ;;  %s492_s12 = smov 0   ;;  %s521_s0 = inlined_call_operand.vmem [shape: s32[8,8,1], index: 0, kind: input, shape index: {}]   ;;  %s522_s1 = inlined_call_operand.vmem [shape: f32[8,128], index: 1, kind: input, shape index: {}]   ;;  %s523_s2 = inlined_call_operand.hbm [shape: f32[200,128], index: 2, kind: input, shape index: {}]   ;;  %s524_s3 = inlined_call_operand.vmem [shape: f32[8,8,128], index: 3, kind: output, shape index: {}]  }
   0x1 LB: > { %s127_s15 = sshll.u32 %s523_s2, 4  ;;  %s377_s16 = sadd.s32 4294967295, %s463_s12   ;;  %s463_s12 = sphi %s492_s12, %s14_s12   ;;  %s128_s15 = int_to_ptr.hbm [resolvable:$true] %s127_s15 }
   0x2   : > { %p379_p0 = scmp.ge.s32.totalorder %s463_s12, 1  ;;  %p113_p1 = scmp.lt.s32.totalorder %s463_s12, 9 }
   0x3   : > { %p380_p2 = scmp.ne.s32.totalorder %s377_s16, 0  ;;  %p400_p3 = scmp.eq.s32.totalorder %s377_s16, 0 }
   0x4   : > { %p114_p4 = pnand %p379_p0, %p113_p1  ;;  %s465_s17 = smov [#allocation3]  }
   0x5   : > { %s129_s18 = sshll.u32 %s465_s17, 4  ;;  %s466_s19 = smov 128   ;;  %s130_s18 = int_to_ptr.vmem [resolvable:$true] %s129_s18 }
   0x6   : > { %p396_p5 = pneg %p114_p4  ;;  %s467_s20 = smov 8  }
   0x7   : > { %152 = sbr.rel (%p114_p4) target bundleno = 547 (0x223), region = 32 }
   0x8   : > { %p397_p6 = pnand %p400_p3, %p396_p5 }
   0xa   : > { %399 = dma.hbm_to_vmem [thread:$0]  (!%p397_p6), %s128_s15, 3200, %s130_s18, [#allocation4], %s466_s19, %s466_s19, %s467_s20  }
   0xc   : > { %458 = dma.done.wait (%p400_p3), [#allocation4], 3200  }
   0xd   : > { %460 = vsyncadd (%p400_p3), [#allocation4], 4294964096  ;;  %p175_p7 = scmp.lt.s32.totalorder %s377_s16, 7 }
   0xe   : > { %186 = sbr.rel (%p380_p2) target bundleno = 21 (0x15), region = 40 }
   0xf   : > { %s176_s21 = scalar_select %p175_p7, %s377_s16, 7 }
  0x11   : > { %s384_s22 = sshll.u32 %s176_s21, 3 }
  0x12   : > { %s178_s25 = scalar_lea.vmem %s521_s0, %s384_s22  ;;  %s509_s28 = scalar_lea.vmem %s524_s3, %s384_s22 }
  0x13   : > { %v187_v0 = vld [vmem:[%s522_s1] sm:$0xff] }
  0x14   : > { %188 = vst [vmem:[#allocation2] sm:$0xff] %v187_v0 }
  0x15 PF: > { %v191_v1 = vld [vmem:[%s178_s25] sm:$0xff]  ;;  %v215_v3 = vld [vmem:[#allocation3 + $0x70] sm:$0xff]  ;;  %v468_v4 = vmov 0   ;;  %v214_v5 = vld [vmem:[#allocation3 + $0x68] sm:$0xff]  ;;  %v189_v19 = vlaneseq  ;;  %v469_v23 = vmov 0.0   ;;  %s470_s4 = smov 96  }
  0x16   : > { %v216_v2 = vld [vmem:[#allocation3 + $0x78] sm:$0xff]  ;;  %417 = vset.pattern.permute.xlu0 %v468_v4  ;;  %v213_v6 = vld [vmem:[#allocation3 + $0x60] sm:$0xff]  ;;  %v211_v8 = vld [vmem:[#allocation3 + $0x50] sm:$0xff]  ;;  %vm246_vm2 = vcmask 261120   ;;  %s471_s5 = smov 64   ;;  %vm306_vm3 = vcmask 523264  }
  0x17   : > { %217 = vmatpush.msra.mxu0 %v216_v2  ;;  %193 = vperm.xlu0 %417, %v191_v1   ;;  %v212_v7 = vld [vmem:[#allocation3 + $0x58] sm:$0xff]  ;;  %v210_v9 = vld [vmem:[#allocation3 + $0x48] sm:$0xff]  ;;  %v209_v10 = vld [vmem:[#allocation3 + $0x40] sm:$0xff]  ;;  %v190_v20 = vand.u32 127, %v189_v19  ;;  %vm308_vm4 = vcmask 785408  }
  0x18   : > { %v208_v11 = vld [vmem:[#allocation3 + $0x38] sm:$0xff]  ;;  %v207_v12 = vld [vmem:[#allocation3 + $0x30] sm:$0xff]  ;;  %v206_v13 = vld [vmem:[#allocation3 + $0x28] sm:$0xff] }
  0x19   : > { %218 = vmatpush.msra.mxu0 %v215_v3  ;;  %v205_v14 = vld [vmem:[#allocation3 + $0x20] sm:$0xff]  ;;  %v204_v15 = vld [vmem:[#allocation3 + $0x18] sm:$0xff]  ;;  %v203_v16 = vld [vmem:[#allocation3 + $0x10] sm:$0xff]  ;;  %vm198_vm0 = vcmp.lt.s32.totalorder %v190_v20, 64 }
  0x1a   : > { %v202_v17 = vld [vmem:[#allocation3 + $0x8] sm:$0xff]  ;;  %v201_v18 = vld [vmem:[#allocation3] sm:$0xff]  ;;  %v241_v26 = vld [vmem:[#allocation3 + $0x98] sm:$0xff] }
  0x1b   : > { %219 = vmatpush.msra.mxu0 %v214_v5  ;;  %v199_v22 = vld [vmem:[#allocation2] sm:$0xff]  ;;  %262 = vmatpush.msra.mxu1 %v241_v26  ;;  %v240_v27 = vld [vmem:[#allocation3 + $0x90] sm:$0xff]  ;;  %v239_v28 = vld [vmem:[#allocation3 + $0x88] sm:$0xff] }
  0x1c   : > { %v238_v29 = vld [vmem:[#allocation3 + $0x80] sm:$0xff]  ;;  %v274_v32 = vld [vmem:[#allocation3 + $0xb8] sm:$0xff]  ;;  %v273_v33 = vld [vmem:[#allocation3 + $0xb0] sm:$0xff] }
  0x1d   : > { %220 = vmatpush.msra.mxu0 %v213_v6  ;;  %263 = vmatpush.msra.mxu1 %v240_v27  ;;  %v272_v34 = vld [vmem:[#allocation3 + $0xa8] sm:$0xff]  ;;  %v271_v35 = vld [vmem:[#allocation3 + $0xa0] sm:$0xff] }
  0x1e   : > { %292 = vmatpush.msra.mxu2 %v274_v32  ;;  %v418_v41 = vld [vmem:[#allocation3 + $0xc0] ss:$0 sm:$0xff] }
  0x1f   : > { %221 = vmatpush.msra.mxu0 %v212_v7  ;;  %264 = vmatpush.msra.mxu1 %v239_v28 }
  0x20   : > { %293 = vmatpush.msra.mxu2 %v273_v33 }
  0x21   : > { %222 = vmatpush.msra.mxu0 %v211_v8  ;;  %265 = vmatpush.msra.mxu1 %v238_v29 }
  0x22   : > { %294 = vmatpush.msra.mxu2 %v272_v34 }
  0x23   : > { %223 = vmatpush.msra.mxu0 %v210_v9 }
  0x24   : > { %295 = vmatpush.msra.mxu2 %v271_v35 }
  0x25   : > { %224 = vmatpush.msra.mxu0 %v209_v10 }
  0x27   : > { %225 = vmatpush.msra.mxu0 %v208_v11 }
  0x29   : > { %226 = vmatpush.msra.mxu0 %v207_v12 }
  0x2b   : > { %227 = vmatpush.msra.mxu0 %v206_v13 }
  0x2d   : > { %228 = vmatpush.msra.mxu0 %v205_v14 }
  0x2f   : > { %229 = vmatpush.msra.mxu0 %v204_v15 }
  0x31   : > { %230 = vmatpush.msra.mxu0 %v203_v16 }
  0x33   : > { %231 = vmatpush.msra.mxu0 %v202_v17 }
  0x35   : > { %232 = vmatpush.msra.mxu0 %v201_v18 }
  0x89   : > { %v194_v21 = vpop.permute.xlu0 %193 }
  0x8a   : > { %vm195_vm1 = vcmp.eq.s32.totalorder %v190_v20, %v194_v21 }
  0x8b   : > { %v387_v24 = vsel %vm195_vm1, 1.0, %v469_v23 }
  0x8c   : > { %v200_v25 = vsel %vm198_vm0, %v387_v24, %v199_v22 }
  0x8d   : > { %233 = vmatmul.f32.vlgmr.msra.gmra.mxu0 %v200_v25 }
 0x10a   : > { %v234_v30 = vpop.f32.mrf.mxu0 }
 0x10b   : > { %419 = vtanh.f32 %v234_v30  ;;  %243 = vrot.lane.b32.xlu0 %v234_v30, %s470_s4 }
 0x111   : > { %v420_v31 = vpop.eup %419 }
 0x112   : > { %300 = vrot.lane.b32.xlu1 %v420_v31, %s471_s5  ;;  %388 = vmatmul.msk.f32.vlgmr.msra.gmra.mxu1 %vm246_vm2, %v420_v31 }
 0x17d   : > { %v244_v36 = vpop.permute.xlu0 %243 }
 0x184   : > { %v301_v40 = vpop.permute.xlu1 %300 }
 0x18f   : > { %v267_v37 = vpop.f32.mrf.mxu1 }
 0x190   : > { %v268_v38 = vadd.f32 %v267_v37, %v244_v36 }
 0x192   : > { %421 = vtanh.f32 %v268_v38 }
 0x198   : > { %v422_v39 = vpop.eup %421 }
 0x199   : > { %303 = vrot.lane.b32.xlu1 %v422_v39, %s470_s4  ;;  %389 = vmatmul.msk.f32.vlgmr.msra.gmra.mxu2 %vm246_vm2, %v422_v39 }
 0x20b   : > { %v304_v44 = vpop.permute.xlu1 %303 }
 0x21c   : > { %v297_v42 = vpop.f32.mrf.mxu2 }
 0x21d   : > { %v298_v43 = vadd.f32 %v418_v41, %v297_v42 }
 0x21f   : > { %v307_v45 = vsel %vm306_vm3, %v298_v43, %v301_v40 }
 0x220   : > { %v309_v46 = vsel %vm308_vm4, %v307_v45, %v304_v44 }
 0x221   : > { %310 = vst [vmem:[%s509_s28] sm:$0xff] %v309_v46 }
 0x222   : > { %311 = vst [vmem:[#allocation2] sm:$0xff] %v309_v46 }
 0x223 PF: > { %s14_s12 = sadd.s32 1, %s463_s12  }
 0x224   : > { %p11_p8 = scmp.ge.s32.totalorder %s14_s12, 10  }
 0x226   :  { %13 = sbr.rel (!%p11_p8) target bundleno = 1 (0x1), region = 71 }
 0x22b   :  { %331 = vsyncpa [#allocation4], 1 }
 0x22c   :  { %333 = vsyncpa [#allocation4 + $0x1], 1 }

</bundles_post_ra>
